<compile_context>
chip_gen: v7x
topology: tpu7x:2x2x1
jax: 0.10.0
libtpu: 0.0.40
codegen_flags: <defaults>
</compile_context>

<pallas_src>
import jax
import jax.numpy as jnp
from jax.experimental import pallas as pl
from jax.experimental.pallas import tpu as pltpu


def _round_up(v, m):
    return ((v + m - 1) // m) * m


def _mlp_body(x_ref, w1_ref, b1_ref, w2_ref, b2_ref, w3_ref, b3_ref):
    # x is f32 in HBM; cast the (tiny) tile to bf16 in-kernel for the MXU.
    x = x_ref[...].astype(jnp.bfloat16)
    h = jnp.dot(x, w1_ref[...], preferred_element_type=jnp.float32)
    # bf16 epilogue (bias + ReLU): halves VALU work on v6e/v7x, and the bf16
    # activations feed the next MXU pass with no extra cast.
    h = jnp.maximum(h.astype(jnp.bfloat16) + b1_ref[...], 0)
    h = jnp.dot(h, w2_ref[...], preferred_element_type=jnp.float32)
    h = jnp.maximum(h.astype(jnp.bfloat16) + b2_ref[...], 0)
    q = jnp.dot(h, w3_ref[...], preferred_element_type=jnp.float32)
    return q + b3_ref[...]                       # final epilogue stays f32


def _dqn_kernel(x_ref, w1_ref, b1_ref, w2_ref, b2_ref, w3_ref, b3_ref, o_ref):
    o_ref[...] = _mlp_body(x_ref, w1_ref, b1_ref, w2_ref, b2_ref, w3_ref, b3_ref)


def _dqn_masked_kernel(x_ref, w1_ref, b1_ref, w2_ref, b2_ref, w3_ref, b3_ref,
                       mask_ref, o_ref):
    q = _mlp_body(x_ref, w1_ref, b1_ref, w2_ref, b2_ref, w3_ref, b3_ref)
    # Exact module semantics: q - (1 - mask) * 1e10, computed in f32.
    # 1e10 is a Python literal -> folded into the kernel, nothing captured.
    o_ref[...] = q - (1.0 - mask_ref[...].astype(jnp.float32)) * 1e10


def init_dqn_params(key, n_states, n_actions, hidden=128):
    """layer_init equivalent: orthogonal(std=sqrt(2)) weights, zero biases.

    Weights are stored transposed vs. PyTorch Linear ((in, out) instead of
    (out, in)) and already cast to bf16 once here (hidden biases too); the
    final-layer bias stays f32 for the f32 output epilogue.
    """
    k1, k2, k3 = jax.random.split(key, 3)
    ortho = jax.nn.initializers.orthogonal(scale=2.0 ** 0.5)
    w1 = ortho(k1, (n_states, hidden), jnp.float32).astype(jnp.bfloat16)
    w2 = ortho(k2, (hidden, hidden), jnp.float32).astype(jnp.bfloat16)
    w3 = ortho(k3, (hidden, n_actions), jnp.float32).astype(jnp.bfloat16)
    b1 = jnp.zeros((1, hidden), jnp.bfloat16)
    b2 = jnp.zeros((1, hidden), jnp.bfloat16)
    b3 = jnp.zeros((1, n_actions), jnp.float32)
    return (w1, b1, w2, b2, w3, b3)


def deep_q_forward(x, params, action_masks=None, *, batch_tile=4096):
    """Pallas implementation of DeepQNetwork.forward.

    x:            (B, n_states) float32
    params:       (w1, b1, w2, b2, w3, b3), weights bf16 in (in, out) layout
    action_masks: optional (B, n_actions), 1 = legal, 0 = masked (any float
                  dtype; bf16 recommended to halve the mask HBM stream)
    returns:      (B, n_actions) float32 Q-values
    """
    w1, b1, w2, b2, w3, b3 = params
    B, S = x.shape
    H = w1.shape[1]
    A = w3.shape[1]
    assert w1.shape[0] == S and w2.shape == (H, H) and w3.shape[0] == H

    # Batch tiling. No wrapper-side padding: a ragged tail block is clipped by
    # Pallas on store, and rows are independent so garbage in the padded read
    # region never reaches a valid output row.
    batch_tile = max(8, (batch_tile // 8) * 8)
    if B <= 256:
        TB = B                                   # single full-extent block
    else:
        # >= 2 grid steps so v7x's two TensorCores can split the batch.
        TB = min(batch_tile, max(256, _round_up(pl.cdiv(B, 2), 8)))
    grid = (pl.cdiv(B, TB),)

    x_spec = pl.BlockSpec((TB, S), lambda i: (i, 0))
    o_spec = pl.BlockSpec((TB, A), lambda i: (i, 0))
    param_specs = [
        pl.BlockSpec((S, H), lambda i: (0, 0)),
        pl.BlockSpec((1, H), lambda i: (0, 0)),
        pl.BlockSpec((H, H), lambda i: (0, 0)),
        pl.BlockSpec((1, H), lambda i: (0, 0)),
        pl.BlockSpec((H, A), lambda i: (0, 0)),
        pl.BlockSpec((1, A), lambda i: (0, 0)),
    ]
    cparams = pltpu.CompilerParams(
        dimension_semantics=("parallel",),
        # v5e's scoped-VMEM default is 16 MiB; ~7 MiB/step at TB=4096, so
        # 32 MiB keeps the large tile on every generation.
        vmem_limit_bytes=32 * 1024 * 1024,
    )

    if action_masks is None:
        # Static unmasked variant: one fewer input stream on the hot path.
        return pl.pallas_call(
            _dqn_kernel,
            out_shape=jax.ShapeDtypeStruct((B, A), jnp.float32),
            grid=grid,
            in_specs=[x_spec] + param_specs,
            out_specs=o_spec,
            compiler_params=cparams,
        )(x, w1, b1, w2, b2, w3, b3)

    mask_spec = pl.BlockSpec((TB, A), lambda i: (i, 0))
    return pl.pallas_call(
        _dqn_masked_kernel,
        out_shape=jax.ShapeDtypeStruct((B, A), jnp.float32),
        grid=grid,
        in_specs=[x_spec] + param_specs + [mask_spec],
        out_specs=o_spec,
        compiler_params=cparams,
    )(x, w1, b1, w2, b2, w3, b3, action_masks)


if __name__ == "__main__":
    # Small, module-consistent shapes: discrete obs (one-hot), discrete actions.
    B = 2            # batch
    N_STATES = 16    # envs.single_observation_space.n
    N_ACTIONS = 8    # envs.single_action_space.n
    HIDDEN = 128

    key = jax.random.PRNGKey(0)
    k_p, k_x, k_m = jax.random.split(key, 3)

    params = init_dqn_params(k_p, N_STATES, N_ACTIONS, HIDDEN)

    # Observations: one-hot encoded discrete states (f32; kernel casts to bf16).
    state_ids = jax.random.randint(k_x, (B,), 0, N_STATES)
    x = jax.nn.one_hot(state_ids, N_STATES, dtype=jnp.float32)

    # Action masks supplied as bf16 (exact for 0/1), at least one legal action.
    masks = (jax.random.uniform(k_m, (B, N_ACTIONS)) > 0.5).astype(jnp.bfloat16)
    masks = masks.at[:, 0].set(1.0)

    # Unmasked path (static mask-free kernel) and masked path.
    q_unmasked = jax.block_until_ready(deep_q_forward(x, params))
    q_masked = jax.block_until_ready(deep_q_forward(x, params, action_masks=masks))

    # Plain-JAX f32 reference (same math as the PyTorch module), built from the
    # stored (bf16) weights upcast to f32.
    w1, b1, w2, b2, w3, b3 = [p.astype(jnp.float32) for p in params]
    h = jnp.maximum(x @ w1 + b1, 0.0)
    h = jnp.maximum(h @ w2 + b2, 0.0)
    q_ref = h @ w3 + b3
    q_ref_masked = q_ref - (1.0 - masks.astype(jnp.float32)) * 1e10

    assert q_unmasked.shape == (B, N_ACTIONS)
    assert jnp.allclose(q_unmasked, q_ref, atol=2e-2, rtol=2e-2), "unmasked mismatch"
    assert jnp.allclose(q_masked, q_ref_masked, atol=2e-2, rtol=1e-4), "masked mismatch"

    # Exercise the multi-step grid + ragged-tail path (2 blocks: 256 + 16 rows).
    B2 = 272
    ids2 = jax.random.randint(jax.random.PRNGKey(1), (B2,), 0, N_STATES)
    x2 = jax.nn.one_hot(ids2, N_STATES, dtype=jnp.float32)
    q2 = jax.block_until_ready(deep_q_forward(x2, params))
    h2 = jnp.maximum(x2 @ w1 + b1, 0.0)
    h2 = jnp.maximum(h2 @ w2 + b2, 0.0)
    q2_ref = h2 @ w3 + b3
    assert q2.shape == (B2, N_ACTIONS)
    assert jnp.allclose(q2, q2_ref, atol=2e-2, rtol=2e-2), "tiled-batch mismatch"

    print("KERNEL_OK")
</pallas_src>

<mosaic_0001>
module attributes {stable_mosaic.version = 11 : i64} {
  func.func @_dqn_kernel(%arg0: i32, %arg1: memref<2x16xf32, #tpu.memory_space<vmem>>, %arg2: memref<16x128xbf16, #tpu.memory_space<vmem>>, %arg3: memref<1x128xbf16, #tpu.memory_space<vmem>>, %arg4: memref<128x128xbf16, #tpu.memory_space<vmem>>, %arg5: memref<1x128xbf16, #tpu.memory_space<vmem>>, %arg6: memref<128x8xbf16, #tpu.memory_space<vmem>>, %arg7: memref<1x8xf32, #tpu.memory_space<vmem>>, %arg8: memref<2x8xf32, #tpu.memory_space<vmem>>) attributes {dimension_semantics = [#tpu.dimension_semantics<parallel>], iteration_bounds = array<i64: 1>, scalar_prefetch = 0 : i64, scratch_operands = 0 : i64, tpu.core_type = #tpu.core_type<tc>, window_params = [{transform_indices = @transform_0, window_bounds = array<i64: 2, 16>}, {pipeline_mode = #tpu.pipeline_mode<synchronous>, transform_indices = @transform_1, window_bounds = array<i64: 16, 128>}, {pipeline_mode = #tpu.pipeline_mode<synchronous>, transform_indices = @transform_2, window_bounds = array<i64: 1, 128>}, {pipeline_mode = #tpu.pipeline_mode<synchronous>, transform_indices = @transform_3, window_bounds = array<i64: 128, 128>}, {pipeline_mode = #tpu.pipeline_mode<synchronous>, transform_indices = @transform_4, window_bounds = array<i64: 1, 128>}, {pipeline_mode = #tpu.pipeline_mode<synchronous>, transform_indices = @transform_5, window_bounds = array<i64: 128, 8>}, {pipeline_mode = #tpu.pipeline_mode<synchronous>, transform_indices = @transform_6, window_bounds = array<i64: 1, 8>}, {transform_indices = @transform_7, window_bounds = array<i64: 2, 8>}]} {
    %c0 = arith.constant 0 : index
    %c0_0 = arith.constant 0 : index
    %0 = vector.load %arg1[%c0, %c0_0] : memref<2x16xf32, #tpu.memory_space<vmem>>, vector<2x16xf32>
    %1 = arith.truncf %0 : vector<2x16xf32> to vector<2x16xbf16>
    %c0_1 = arith.constant 0 : index
    %c0_2 = arith.constant 0 : index
    %2 = vector.load %arg2[%c0_1, %c0_2] : memref<16x128xbf16, #tpu.memory_space<vmem>>, vector<16x128xbf16>
    %cst = arith.constant dense<0.000000e+00> : vector<2x128xf32>
    %3 = tpu.matmul %1, %2, %cst {dimension_numbers = #tpu.dot_dimension_numbers<[1], [0], [0], [1], [0, 0, 1, 1], [], []>} : vector<2x16xbf16>, vector<16x128xbf16>, vector<2x128xf32> -> vector<2x128xf32>
    %4 = arith.truncf %3 : vector<2x128xf32> to vector<2x128xbf16>
    %c0_3 = arith.constant 0 : index
    %c0_4 = arith.constant 0 : index
    %5 = vector.load %arg3[%c0_3, %c0_4] : memref<1x128xbf16, #tpu.memory_space<vmem>>, vector<1x128xbf16>
    %6 = vector.broadcast %5 : vector<1x128xbf16> to vector<2x128xbf16>
    %7 = arith.addf %4, %6 : vector<2x128xbf16>
    %cst_5 = arith.constant 0.000000e+00 : bf16
    %8 = vector.broadcast %cst_5 : bf16 to vector<2x128xbf16>
    %9 = arith.maximumf %7, %8 : vector<2x128xbf16>
    %c0_6 = arith.constant 0 : index
    %c0_7 = arith.constant 0 : index
    %10 = vector.load %arg4[%c0_6, %c0_7] : memref<128x128xbf16, #tpu.memory_space<vmem>>, vector<128x128xbf16>
    %cst_8 = arith.constant dense<0.000000e+00> : vector<2x128xf32>
    %11 = tpu.matmul %9, %10, %cst_8 {dimension_numbers = #tpu.dot_dimension_numbers<[1], [0], [0], [1], [0, 0, 1, 1], [], []>} : vector<2x128xbf16>, vector<128x128xbf16>, vector<2x128xf32> -> vector<2x128xf32>
    %12 = arith.truncf %11 : vector<2x128xf32> to vector<2x128xbf16>
    %c0_9 = arith.constant 0 : index
    %c0_10 = arith.constant 0 : index
    %13 = vector.load %arg5[%c0_9, %c0_10] : memref<1x128xbf16, #tpu.memory_space<vmem>>, vector<1x128xbf16>
    %14 = vector.broadcast %13 : vector<1x128xbf16> to vector<2x128xbf16>
    %15 = arith.addf %12, %14 : vector<2x128xbf16>
    %cst_11 = arith.constant 0.000000e+00 : bf16
    %16 = vector.broadcast %cst_11 : bf16 to vector<2x128xbf16>
    %17 = arith.maximumf %15, %16 : vector<2x128xbf16>
    %c0_12 = arith.constant 0 : index
    %c0_13 = arith.constant 0 : index
    %18 = vector.load %arg6[%c0_12, %c0_13] : memref<128x8xbf16, #tpu.memory_space<vmem>>, vector<128x8xbf16>
    %cst_14 = arith.constant dense<0.000000e+00> : vector<2x8xf32>
    %19 = tpu.matmul %17, %18, %cst_14 {dimension_numbers = #tpu.dot_dimension_numbers<[1], [0], [0], [1], [0, 0, 1, 1], [], []>} : vector<2x128xbf16>, vector<128x8xbf16>, vector<2x8xf32> -> vector<2x8xf32>
    %c0_15 = arith.constant 0 : index
    %c0_16 = arith.constant 0 : index
    %20 = vector.load %arg7[%c0_15, %c0_16] : memref<1x8xf32, #tpu.memory_space<vmem>>, vector<1x8xf32>
    %21 = vector.broadcast %20 : vector<1x8xf32> to vector<2x8xf32>
    %22 = arith.addf %19, %21 : vector<2x8xf32>
    %c0_17 = arith.constant 0 : index
    %c0_18 = arith.constant 0 : index
    %23 = vector.load %arg8[%c0_17, %c0_18] : memref<2x8xf32, #tpu.memory_space<vmem>>, vector<2x8xf32>
    tpu.vector_store %arg8[%c0_17, %c0_18], %22 {strides = array<i32>} : memref<2x8xf32, #tpu.memory_space<vmem>>, vector<2x8xf32>,
    return
  }
  func.func @transform_0(%arg0: i32) -> (i32, i32) {
    %c0_i32 = arith.constant 0 : i32
    %c0_i32_0 = arith.constant 0 : i32
    return %arg0, %c0_i32 : i32, i32
  }
  func.func @transform_1(%arg0: i32) -> (i32, i32) {
    %c0_i32 = arith.constant 0 : i32
    %c0_i32_0 = arith.constant 0 : i32
    %c0_i32_1 = arith.constant 0 : i32
    return %c0_i32, %c0_i32_0 : i32, i32
  }
  func.func @transform_2(%arg0: i32) -> (i32, i32) {
    %c0_i32 = arith.constant 0 : i32
    %c0_i32_0 = arith.constant 0 : i32
    %c0_i32_1 = arith.constant 0 : i32
    return %c0_i32, %c0_i32_0 : i32, i32
  }
  func.func @transform_3(%arg0: i32) -> (i32, i32) {
    %c0_i32 = arith.constant 0 : i32
    %c0_i32_0 = arith.constant 0 : i32
    %c0_i32_1 = arith.constant 0 : i32
    return %c0_i32, %c0_i32_0 : i32, i32
  }
  func.func @transform_4(%arg0: i32) -> (i32, i32) {
    %c0_i32 = arith.constant 0 : i32
    %c0_i32_0 = arith.constant 0 : i32
    %c0_i32_1 = arith.constant 0 : i32
    return %c0_i32, %c0_i32_0 : i32, i32
  }
  func.func @transform_5(%arg0: i32) -> (i32, i32) {
    %c0_i32 = arith.constant 0 : i32
    %c0_i32_0 = arith.constant 0 : i32
    %c0_i32_1 = arith.constant 0 : i32
    return %c0_i32, %c0_i32_0 : i32, i32
  }
  func.func @transform_6(%arg0: i32) -> (i32, i32) {
    %c0_i32 = arith.constant 0 : i32
    %c0_i32_0 = arith.constant 0 : i32
    %c0_i32_1 = arith.constant 0 : i32
    return %c0_i32, %c0_i32_0 : i32, i32
  }
  func.func @transform_7(%arg0: i32) -> (i32, i32) {
    %c0_i32 = arith.constant 0 : i32
    %c0_i32_0 = arith.constant 0 : i32
    return %arg0, %c0_i32 : i32, i32
  }
}

</mosaic_0001>

<bundles_post_ra>
// kernel: tpu_custom_call.1
= control target key start
LH: loop header
LB: loop body
LE: loop exit
PB: predicated region body
PF: predicated region fallthrough
CT: control target
= control target key end

     0   :  { %v465_v1 = vmov 0.0   ;;  %vm466_vm0 = vmmov 0   ;;  %vm38_vm1 = vcmask 130048   ;;  %s604_s0 = inlined_call_operand.vmem [shape: f32[2,16], index: 0, kind: input, shape index: {}]   ;;  %s605_s1 = inlined_call_operand.vmem [shape: bf16[16,128], index: 1, kind: input, shape index: {}]   ;;  %s606_s2 = inlined_call_operand.vmem [shape: bf16[1,128], index: 2, kind: input, shape index: {}]   ;;  %s607_s3 = inlined_call_operand.vmem [shape: bf16[128,128], index: 3, kind: input, shape index: {}]   ;;  %s608_s4 = inlined_call_operand.vmem [shape: bf16[1,128], index: 4, kind: input, shape index: {}]   ;;  %s609_s5 = inlined_call_operand.vmem [shape: bf16[128,8], index: 5, kind: input, shape index: {}]   ;;  %s610_s6 = inlined_call_operand.vmem [shape: f32[1,8], index: 6, kind: input, shape index: {}]   ;;  %s611_s7 = inlined_call_operand.hbm [shape: f32[2,8], index: 7, kind: output, shape index: {}]  }
   0x1   :  { %v424_v0 = vld [vmem:[%s605_s1] sm:$0xff]   ;;  %374 = vmatprep.subr.bf16.mxu0 %v465_v1  ;;  %380 = vmatprep.subr.bf16.mxu1 %v465_v1  ;;  %v426_v5 = vld [vmem:[%s607_s3 + $0x8] sm:$0xff]   ;;  %v427_v6 = vld [vmem:[%s607_s3 + $0x10] sm:$0xff]  }
   0x2   :  { %v28_v2 = vld [vmem:[%s604_s0] sm:$0x3]  ;;  %375 = vmatpush3.bf16.msra.mxu0 %v424_v0  ;;  %376 = vmatprep.mubr.msk.bf16.mxu0 %vm466_vm0, %v465_v1  ;;  %v428_v7 = vld [vmem:[%s607_s3 + $0x18] sm:$0xff]  }
   0x3   :  { %v29_v3 = vpack.c.bf16 %v28_v2, %v28_v2  ;;  %v425_v4 = vld [vmem:[%s607_s3] sm:$0xff]   ;;  %396 = vmatprep.mubr.msk.bf16.mxu1 %vm466_vm0, %v465_v1  ;;  %400 = vmatprep.subr.bf16.mxu0 %v465_v1 }
   0x4   :  { %381 = vmatpush3.bf16.msra.mxu1 %v425_v4 }
   0x5   :  { %377 = vmatmul.mubr.msk.bf16.vlgmr.msra.gmra.mrb[0].mxu0 %vm38_vm1, %v29_v3  ;;  %382 = vmatprep.subr.bf16.mxu1 %v465_v1 }
   0x6   :  { %416 = vmatprep.mubr.msk.bf16.mxu0 %vm466_vm0, %v465_v1 }
   0x8   :  { %383 = vmatpush3.bf16.msra.mxu1 %v426_v5 }
   0x9   :  { %384 = vmatprep.subr.bf16.mxu1 %v465_v1 }
   0xc   :  { %385 = vmatpush3.bf16.msra.mxu1 %v427_v6 }
   0xd   :  { %386 = vmatprep.subr.bf16.mxu1 %v465_v1 }
   0xe   :  { %12 = vsyncpa [#allocation3], 0  ;;  %v429_v8 = vld [vmem:[%s607_s3 + $0x20] sm:$0xff]   ;;  %v430_v9 = vld [vmem:[%s607_s3 + $0x28] sm:$0xff]   ;;  %v87_v18 = vlaneseq  ;;  %v467_v30 = vmov 0   ;;  %vm319_vm2 = vcmask 58368  }
   0xf   :  { %v431_v10 = vld [vmem:[%s607_s3 + $0x30] sm:$0xff]   ;;  %v432_v11 = vld [vmem:[%s607_s3 + $0x38] sm:$0xff]   ;;  %v433_v12 = vld [vmem:[%s609_s5] sm:$0xff]  }
  0x10   :  { %387 = vmatpush3.bf16.msra.mxu1 %v428_v7  ;;  %401 = vmatpush3.bf16.msra.mxu0 %v433_v12  ;;  %v434_v13 = vld [vmem:[%s609_s5 + $0x8] sm:$0xff]   ;;  %v435_v14 = vld [vmem:[%s609_s5 + $0x10] sm:$0xff]   ;;  %v436_v15 = vld [vmem:[%s609_s5 + $0x18] sm:$0xff]   ;;  %v88_v19 = vshrl.u32 %v87_v18, 7 }
  0x11   :  { %388 = vmatprep.subr.bf16.mxu1 %v465_v1  ;;  %402 = vmatprep.subr.bf16.mxu0 %v465_v1  ;;  %v437_v16 = vld [vmem:[%s609_s5 + $0x20] sm:$0xff]   ;;  %v438_v17 = vld [vmem:[%s609_s5 + $0x28] sm:$0xff]   ;;  %v439_v32 = vld [vmem:[%s609_s5 + $0x30] sm:$0xff]  }
  0x12   :  { %v83_v20 = vld [vmem:[%s606_s2] sm:$0x1]  ;;  %v89_v22 = vsub.s32 0, %v88_v19  ;;  %v440_v33 = vld [vmem:[%s609_s5 + $0x38] sm:$0xff]   ;;  %s468_s5 = smov [#allocation2]  }
  0x13   :  { %v85_v21 = vpack.i.b16 %v83_v20, %v83_v20  ;;  %v198_v34 = vld [vmem:[%s608_s4] sm:$0x1]  ;;  %s327_s14 = sshll.u32 %s468_s5, 4  ;;  %s328_s14 = int_to_ptr.vmem [resolvable:$true] %s327_s14 }
  0x14   :  { %389 = vmatpush3.bf16.msra.mxu1 %v429_v8  ;;  %403 = vmatpush3.bf16.msra.mxu0 %v434_v13  ;;  %v200_v35 = vpack.i.b16 %v198_v34, %v198_v34  ;;  %v345_v44 = vld [vmem:[%s610_s6] ss:$0 sm:$0xff]  ;;  %s441_s4 = scalar_lea.vmem %s328_s14, 32  ;;  %p446_p1 = scmp.lt.s32.totalorder %s328_s14, %s328_s14 }
  0x15   :  { %390 = vmatprep.subr.bf16.mxu1 %v465_v1  ;;  %404 = vmatprep.subr.bf16.mxu0 %v465_v1  ;;  %v90_v23 = vrot.slane %v85_v21, %v89_v22  ;;  %p442_p0 = scmp.ne.s32.totalorder %s328_s14, %s441_s4  ;;  %p447_p2 = scmp.lt.s32.totalorder %s441_s4, %s441_s4 }
  0x16   :  { %v205_v36 = vrot.slane %v200_v35, %v89_v22 }
  0x17   :  { %p448_p3 = por %p447_p2, %p446_p1 }
  0x18   :  { %391 = vmatpush3.bf16.msra.mxu1 %v430_v9  ;;  %405 = vmatpush3.bf16.msra.mxu0 %v435_v14 }
  0x19   :  { %392 = vmatprep.subr.bf16.mxu1 %v465_v1  ;;  %406 = vmatprep.subr.bf16.mxu0 %v465_v1  ;;  %p449_p4 = pnand %p448_p3, %p442_p0 }
  0x1c   :  { %393 = vmatpush3.bf16.msra.mxu1 %v431_v10  ;;  %407 = vmatpush3.bf16.msra.mxu0 %v436_v15 }
  0x1d   :  { %394 = vmatprep.subr.bf16.mxu1 %v465_v1  ;;  %408 = vmatprep.subr.bf16.mxu0 %v465_v1 }
  0x20   :  { %395 = vmatpush3.bf16.msra.mxu1 %v432_v11  ;;  %409 = vmatpush3.bf16.msra.mxu0 %v437_v16 }
  0x21   :  { %410 = vmatprep.subr.bf16.mxu0 %v465_v1 }
  0x24   :  { %411 = vmatpush3.bf16.msra.mxu0 %v438_v17 }
  0x25   :  { %412 = vmatprep.subr.bf16.mxu0 %v465_v1 }
  0x28   :  { %413 = vmatpush3.bf16.msra.mxu0 %v439_v32 }
  0x29   :  { %414 = vmatprep.subr.bf16.mxu0 %v465_v1 }
  0x2c   :  { %415 = vmatpush3.bf16.msra.mxu0 %v440_v33 }
  0xd8   :  { %v76_v24 = vpop.f32.mrb[0].mxu0 }
  0xd9   :  { %v82_v25 = vpack.c.bf16 %v76_v24, %v76_v24  ;;  %v378_v26 = vpop.f32.mrb[1].mxu0 }
  0xda   :  { %v79_v27 = vpop.f32.mrb[2].mxu0 }
  0xdb   :  { %v91_v28 = vadd.bf16 %v90_v23, %v82_v25  ;;  %v379_v29 = vpop.f32.mrb[3].mxu0 }
  0xdd   :  { %v92_v31 = vmax.bf16 %v467_v30, %v91_v28 }
  0xdf   :  { %397 = vmatmul.mubr.bf16.vlgmr.msra.gmra.mrb[0].mxu1 %v92_v31 }
 0x1b2   :  { %v191_v37 = vpop.f32.mrb[0].mxu1 }
 0x1b3   :  { %v197_v38 = vpack.c.bf16 %v191_v37, %v191_v37  ;;  %v398_v39 = vpop.f32.mrb[1].mxu1 }
 0x1b4   :  { %v194_v40 = vpop.f32.mrb[2].mxu1 }
 0x1b5   :  { %v206_v41 = vadd.bf16 %v205_v36, %v197_v38  ;;  %v399_v42 = vpop.f32.mrb[3].mxu1 }
 0x1b7   :  { %v207_v43 = vmax.bf16 %v467_v30, %v206_v41 }
 0x1b9   :  { %417 = vmatmul.mubr.bf16.vlgmr.msra.gmra.mrb[4].mxu0 %v207_v43 }
 0x28c   :  { %v313_v45 = vpop.f32.mrb[4].mxu0 }
 0x28d   :  { %v314_v46 = vadd.f32 %v345_v44, %v313_v45  ;;  %v418_v47 = vpop.f32.mrb[5].mxu0 }
 0x28e   :  { %v316_v48 = vpop.f32.mrb[6].mxu0 }
 0x28f   :  { %v419_v49 = vpop.f32.mrb[7].mxu0  ;;  %320 = vst.msk [vmem:[#allocation2] sm:$0x3] %vm319_vm2, %v314_v46 }
 0x290   :  { %452 = shalt.err (!%p449_p4)
}
 0x291   :  { %s453_s6 = scalar_lea.hbm %s611_s7, 32 }
 0x292   :  { %p454_p5 = scmp.ne.s32.totalorder %s611_s7, %s453_s6  ;;  %p457_p6 = scmp.lt.u32.totalorder %s453_s6, %s611_s7 }
 0x294   :  { %p459_p7 = pnand %p457_p6, %p454_p5 }
 0x296   :  { %462 = shalt.err (!%p459_p7)
}
 0x297   :  { %330 = dma.vmem_to_hbm [thread:$0]  %s328_s14, 32, %s611_s7, [#allocation3]  }
 0x298   :  { %463 = dma.done.wait [#allocation3], 32  }
 0x299   :  { %464 = vsyncadd [#allocation3], 4294967264 }
 0x29a   :  { %334 = vsyncpa [#allocation3], 1 }

</bundles_post_ra>
